<compile_context>
chip_gen: v5e
topology: v5e:2x2
jax: 0.10.0
libtpu: 0.0.40
codegen_flags: <defaults>
</compile_context>

<pallas_src>
import jax
import jax.numpy as jnp
import numpy as np
from jax.experimental import pallas as pl
from jax.experimental.pallas import tpu as pltpu


# ----------------------------------------------------------------------------
# Shared helper: channel-first conv(1x1)+BN(eval)+ReLU == relu(W^T @ a + b).
# ----------------------------------------------------------------------------
def _cbr_t(wt_ref, b_ref, inp):
    """relu(W^T @ inp + b): W^T (Cout,Cin), inp (Cin,P), b (Cout,1) -> (Cout,P) f32."""
    w = wt_ref[...]
    y = jnp.dot(w, inp.astype(w.dtype), preferred_element_type=jnp.float32)
    return jnp.maximum(y + b_ref[...], 0.0)


# ----------------------------------------------------------------------------
# Proxy kernel: one batch element per grid step.  Computes
#   k^T = f_object(proxy)  and  v^T = f_down(proxy), both (Kc, Kp).
# Tiny (Kp*C*Kc flops); done once so the pixel kernel is stateless per tile.
# ----------------------------------------------------------------------------
def _proxy_kernel(p_ref,
                  wo1t, bo1, wo2t, bo2,     # f_object (2x conv+BN+ReLU)
                  wdt, bd,                  # f_down   (1x conv+BN+ReLU)
                  kt_ref, vt_ref):
    p = p_ref[0]                                            # (C, Kp)
    kt = _cbr_t(wo2t, bo2, _cbr_t(wo1t, bo1, p))            # (Kc, Kp)
    vt = _cbr_t(wdt, bd, p)                                 # (Kc, Kp)
    kt_ref[0] = kt.astype(kt_ref.dtype)
    vt_ref[0] = vt.astype(vt_ref.dtype)


# ----------------------------------------------------------------------------
# Pixel kernel: one (batch, pixel-tile) grid step.  Both axes are "parallel"
# (no cross-tile state), so megacore / v7x 2-TC sharding works even at N=1.
# ----------------------------------------------------------------------------
def _pixel_kernel(x_ref, k_ref, vt_ref,
                  wp1t, bp1, wp2t, bp2,     # f_pixel (2x conv+BN+ReLU), scale folded
                  wut, bu,                  # f_up    (1x conv+BN+ReLU)
                  o_ref):
    x = x_ref[0]                                            # (C, TQ) NCHW-native
    # query^T for this pixel tile; softmax scale pre-folded into wp2t/bp2.
    q = _cbr_t(wp2t, bp2, _cbr_t(wp1t, bp1, x))             # (Kc, TQ) f32

    # sim^T = k @ q^T : plain dot, k already stored (Kp, Kc) — no relayout.
    k = k_ref[0]                                            # (Kp, Kc)
    sim = jnp.dot(k, q.astype(k.dtype),
                  preferred_element_type=jnp.float32)       # (Kp, TQ)

    # Softmax over the proxy axis (axis 0 here); f32 math, divide on the EUP.
    sim = sim - jnp.max(sim, axis=0, keepdims=True)
    e = jnp.exp(sim)
    attn = e * pl.reciprocal(jnp.sum(e, axis=0, keepdims=True), approx=True)

    # context^T = v^T @ attn^T : (Kc, TQ)
    v_t = vt_ref[0]                                         # (Kc, Kp)
    ctx = jnp.dot(v_t, attn.astype(v_t.dtype),
                  preferred_element_type=jnp.float32)       # (Kc, TQ)

    # f_up(context) written channel-first straight into the NCHW output.
    o_ref[0] = _cbr_t(wut, bu, ctx).astype(o_ref.dtype)     # (C, TQ)


# ----------------------------------------------------------------------------
# Wrapper
# ----------------------------------------------------------------------------
def _vmem_limit_bytes():
    """~3/4 of physical VMEM (capped at 100 MiB): ~48 MiB v7x, ~96 MiB v5e/v6e."""
    try:
        cap = int(pltpu.get_tpu_info().vmem_capacity_bytes)
    except Exception:
        return 48 * 1024 * 1024          # safe on every generation
    return int(min(cap * 3 // 4, 100 * 1024 * 1024))


def object_attention_block(x_nchw, proxy_nchw, params, key_channels, *,
                           tq=None, compute_dtype=jnp.float32, out_dtype=None):
    """x_nchw: (N, C, H, W), proxy_nchw: (N, C, Kp, 1). Returns (N, C, H, W)."""
    N, C, H, W = x_nchw.shape
    Kp = proxy_nchw.shape[2] * proxy_nchw.shape[3]
    HW = H * W
    Kc = key_channels
    out_dtype = x_nchw.dtype if out_dtype is None else out_dtype

    vmem_limit = _vmem_limit_bytes()

    # Pixel-tile size: derived from the VMEM budget (double-buffered x/o tiles
    # + f32 intermediates per pixel column), capped at 2048, multiple of 128
    # so the lane (pixel) dim of every load/store is fully dense.
    if tq is None:
        in_b = jnp.dtype(x_nchw.dtype).itemsize
        out_b = jnp.dtype(out_dtype).itemsize
        per_col = 2 * C * in_b + 2 * C * out_b + 4 * (3 * Kc + 3 * Kp + C)
        tq = max(128, (vmem_limit * 6 // 10) // max(per_col, 1))
        tq = min(tq, 2048)
    tq = int(min(tq, HW))
    if tq < HW:
        tq = max(128, (tq // 128) * 128)
        if tq >= HW:
            tq = HW
    num_tiles = pl.cdiv(HW, tq)

    # NCHW -> channel-first flat sequences: pure reshapes, NO transposes.
    x_cf = x_nchw.reshape(N, C, HW)
    p_cf = proxy_nchw.reshape(N, C, Kp)

    (wp1, bp1, wp2, bp2, wo1, bo1, wo2, bo2, wd, bd, wu, bu) = params

    # Fold the softmax scale key_channels**-0.5 into the second f_pixel conv
    # (valid: scale > 0 and relu(c*x) = c*relu(x)).  Weights feed the MXU in
    # compute_dtype (bf16 doubles MXU throughput); biases stay f32 columns.
    scale = float(Kc) ** -0.5

    def prep(w, b, s=1.0):
        return ((w.T * s).astype(compute_dtype),
                (b.reshape(-1, 1) * s).astype(jnp.float32))

    wp1t, bp1c = prep(wp1, bp1)
    wp2t, bp2c = prep(wp2, bp2, scale)
    wo1t, bo1c = prep(wo1, bo1)
    wo2t, bo2c = prep(wo2, bo2)
    wdt,  bdc  = prep(wd, bd)
    wut,  buc  = prep(wu, bu)

    # ---- proxy kernel: k^T, v^T per batch element -------------------------
    w_spec1 = lambda a: pl.BlockSpec(a.shape, lambda b: (0, 0))
    kt_all, vt_all = pl.pallas_call(
        _proxy_kernel,
        out_shape=(jax.ShapeDtypeStruct((N, Kc, Kp), compute_dtype),
                   jax.ShapeDtypeStruct((N, Kc, Kp), compute_dtype)),
        grid_spec=pltpu.PrefetchScalarGridSpec(
            num_scalar_prefetch=0,
            grid=(N,),
            in_specs=[pl.BlockSpec((1, C, Kp), lambda b: (b, 0, 0)),
                      w_spec1(wo1t), w_spec1(bo1c),
                      w_spec1(wo2t), w_spec1(bo2c),
                      w_spec1(wdt), w_spec1(bdc)],
            out_specs=[pl.BlockSpec((1, Kc, Kp), lambda b: (b, 0, 0)),
                       pl.BlockSpec((1, Kc, Kp), lambda b: (b, 0, 0))]),
        compiler_params=pltpu.CompilerParams(
            dimension_semantics=("parallel",),
            vmem_limit_bytes=vmem_limit),
    )(p_cf, wo1t, bo1c, wo2t, bo2c, wdt, bdc)

    # Tiny (N, Kc, Kp) -> (N, Kp, Kc) so the pixel kernel's sim matmul is a
    # plain dot with no per-tile relayout of k.  A few KB of HBM traffic.
    k_all = jnp.swapaxes(kt_all, 1, 2)

    # ---- pixel kernel: both grid axes parallel (stateless per tile) -------
    w_spec2 = lambda a: pl.BlockSpec(a.shape, lambda b, t: (0, 0))
    out_cf = pl.pallas_call(
        _pixel_kernel,
        out_shape=jax.ShapeDtypeStruct((N, C, HW), out_dtype),
        grid_spec=pltpu.PrefetchScalarGridSpec(
            num_scalar_prefetch=0,
            grid=(N, num_tiles),
            in_specs=[pl.BlockSpec((1, C, tq), lambda b, t: (b, 0, t)),
                      pl.BlockSpec((1, Kp, Kc), lambda b, t: (b, 0, 0)),
                      pl.BlockSpec((1, Kc, Kp), lambda b, t: (b, 0, 0)),
                      w_spec2(wp1t), w_spec2(bp1c),
                      w_spec2(wp2t), w_spec2(bp2c),
                      w_spec2(wut), w_spec2(buc)],
            out_specs=pl.BlockSpec((1, C, tq), lambda b, t: (b, 0, t))),
        compiler_params=pltpu.CompilerParams(
            dimension_semantics=("parallel", "parallel"),
            vmem_limit_bytes=vmem_limit),
    )(x_cf, k_all, vt_all, wp1t, bp1c, wp2t, bp2c, wut, buc)

    # (N, C, HW) -> (N, C, H, W) : free reshape, no transpose.
    return out_cf.reshape(N, C, H, W)


# ----------------------------------------------------------------------------
# Deterministic synthetic parameters (conv weight + eval-mode BN folded)
# ----------------------------------------------------------------------------
def _fold_conv_bn(key, cin, cout, eps=1e-5):
    """Returns (W_eff (cin, cout), b_eff (1, cout)) for y = relu(x @ W + b)."""
    k1, k2, k3, k4, k5 = jax.random.split(key, 5)
    w = jax.random.normal(k1, (cout, cin), jnp.float32) * 0.1     # (Cout,Cin,1,1)
    gamma = 1.0 + 0.1 * jax.random.normal(k2, (cout,), jnp.float32)
    beta = 0.1 * jax.random.normal(k3, (cout,), jnp.float32)
    mean = 0.1 * jax.random.normal(k4, (cout,), jnp.float32)
    var = jnp.abs(jax.random.normal(k5, (cout,), jnp.float32)) + 0.5
    s = gamma / jnp.sqrt(var + eps)
    w_eff = (w * s[:, None]).T                # (cin, cout)
    b_eff = (beta - mean * s)[None, :]        # (1, cout)
    return w_eff, b_eff


def make_params(key, in_channels, key_channels):
    ks = jax.random.split(key, 6)
    wp1, bp1 = _fold_conv_bn(ks[0], in_channels, key_channels)
    wp2, bp2 = _fold_conv_bn(ks[1], key_channels, key_channels)
    wo1, bo1 = _fold_conv_bn(ks[2], in_channels, key_channels)
    wo2, bo2 = _fold_conv_bn(ks[3], key_channels, key_channels)
    wd, bd = _fold_conv_bn(ks[4], in_channels, key_channels)
    wu, bu = _fold_conv_bn(ks[5], key_channels, in_channels)
    return (wp1, bp1, wp2, bp2, wo1, bo1, wo2, bo2, wd, bd, wu, bu)


# ----------------------------------------------------------------------------
# Pure-JAX reference (mirrors the PyTorch forward) for correctness check.
# ----------------------------------------------------------------------------
def reference(x_nchw, proxy_nchw, params, key_channels):
    N, C, H, W = x_nchw.shape
    Kp = proxy_nchw.shape[2] * proxy_nchw.shape[3]
    (wp1, bp1, wp2, bp2, wo1, bo1, wo2, bo2, wd, bd, wu, bu) = params
    x = jnp.transpose(x_nchw.reshape(N, C, H * W), (0, 2, 1))
    p = jnp.transpose(proxy_nchw.reshape(N, C, Kp), (0, 2, 1))
    cbr = lambda a, w, b: jnp.maximum(a @ w + b, 0.0)
    q = cbr(cbr(x, wp1, bp1), wp2, bp2)
    k = cbr(cbr(p, wo1, bo1), wo2, bo2)
    v = cbr(p, wd, bd)
    sim = jnp.einsum('nqc,nkc->nqk', q, k) * (key_channels ** -0.5)
    sim = jax.nn.softmax(sim, axis=-1)
    ctx = jnp.einsum('nqk,nkc->nqc', sim, v)
    out = cbr(ctx, wu, bu)
    return jnp.transpose(out, (0, 2, 1)).reshape(N, C, H, W)


if __name__ == "__main__":
    in_channels = 4
    key_channels = 8
    N, H, W = 2, 16, 16
    Kp = 8  # number of object/proxy regions

    key = jax.random.PRNGKey(0)
    kx, kp_, kw = jax.random.split(key, 3)
    x = jax.random.normal(kx, (N, in_channels, H, W), jnp.float32)
    proxy = jax.random.normal(kp_, (N, in_channels, Kp, 1), jnp.float32)
    params = make_params(kw, in_channels, key_channels)

    ref = reference(x, proxy, params, key_channels)

    # f32 matmul path, HW=256 tiled into 2 tiles of 128 pixel columns each.
    out_f32 = object_attention_block(x, proxy, params, key_channels,
                                     tq=128, compute_dtype=jnp.float32)
    out_f32 = jax.block_until_ready(out_f32)
    np.testing.assert_allclose(np.asarray(out_f32), np.asarray(ref),
                               rtol=1e-2, atol=1e-2)

    # bf16 matmul + bf16 output (production configuration) — f32 softmax/acc,
    # TQ auto-derived from the VMEM budget (full 256 pixels in one tile here).
    out_bf16 = object_attention_block(x, proxy, params, key_channels,
                                      compute_dtype=jnp.bfloat16,
                                      out_dtype=jnp.bfloat16)
    out_bf16 = jax.block_until_ready(out_bf16)
    np.testing.assert_allclose(np.asarray(out_bf16.astype(jnp.float32)),
                               np.asarray(ref), rtol=5e-2, atol=5e-2)

    print("KERNEL_OK")
</pallas_src>

<mosaic_0001>
module attributes {stable_mosaic.version = 11 : i64} {
  func.func @_proxy_kernel(%arg0: i32, %arg1: memref<1x4x8xf32, #tpu.memory_space<vmem>>, %arg2: memref<8x4xf32, #tpu.memory_space<vmem>>, %arg3: memref<8x1xf32, #tpu.memory_space<vmem>>, %arg4: memref<8x8xf32, #tpu.memory_space<vmem>>, %arg5: memref<8x1xf32, #tpu.memory_space<vmem>>, %arg6: memref<8x4xf32, #tpu.memory_space<vmem>>, %arg7: memref<8x1xf32, #tpu.memory_space<vmem>>, %arg8: memref<1x8x8xf32, #tpu.memory_space<vmem>>, %arg9: memref<1x8x8xf32, #tpu.memory_space<vmem>>) attributes {dimension_semantics = [#tpu.dimension_semantics<parallel>], iteration_bounds = array<i64: 2>, scalar_prefetch = 0 : i64, scratch_operands = 0 : i64, tpu.core_type = #tpu.core_type<tc>, window_params = [{transform_indices = @transform_0, window_bounds = array<i64: 1, 4, 8>}, {pipeline_mode = #tpu.pipeline_mode<synchronous>, transform_indices = @transform_1, window_bounds = array<i64: 8, 4>}, {pipeline_mode = #tpu.pipeline_mode<synchronous>, transform_indices = @transform_2, window_bounds = array<i64: 8, 1>}, {pipeline_mode = #tpu.pipeline_mode<synchronous>, transform_indices = @transform_3, window_bounds = array<i64: 8, 8>}, {pipeline_mode = #tpu.pipeline_mode<synchronous>, transform_indices = @transform_4, window_bounds = array<i64: 8, 1>}, {pipeline_mode = #tpu.pipeline_mode<synchronous>, transform_indices = @transform_5, window_bounds = array<i64: 8, 4>}, {pipeline_mode = #tpu.pipeline_mode<synchronous>, transform_indices = @transform_6, window_bounds = array<i64: 8, 1>}, {transform_indices = @transform_7, window_bounds = array<i64: 1, 8, 8>}, {transform_indices = @transform_8, window_bounds = array<i64: 1, 8, 8>}]} {
    %c0 = arith.constant 0 : index
    %c0_0 = arith.constant 0 : index
    %c0_1 = arith.constant 0 : index
    %0 = vector.load %arg1[%c0, %c0_0, %c0_1] : memref<1x4x8xf32, #tpu.memory_space<vmem>>, vector<1x4x8xf32>
    %1 = vector.shape_cast %0 : vector<1x4x8xf32> to vector<4x8xf32>
    %c0_2 = arith.constant 0 : index
    %c0_3 = arith.constant 0 : index
    %2 = vector.load %arg2[%c0_2, %c0_3] : memref<8x4xf32, #tpu.memory_space<vmem>>, vector<8x4xf32>
    %cst = arith.constant dense<0.000000e+00> : vector<8x8xf32>
    %3 = tpu.matmul %2, %1, %cst {dimension_numbers = #tpu.dot_dimension_numbers<[1], [0], [0], [1], [0, 0, 1, 1], [], []>} : vector<8x4xf32>, vector<4x8xf32>, vector<8x8xf32> -> vector<8x8xf32>
    %c0_4 = arith.constant 0 : index
    %c0_5 = arith.constant 0 : index
    %4 = vector.load %arg3[%c0_4, %c0_5] : memref<8x1xf32, #tpu.memory_space<vmem>>, vector<8x1xf32>
    %5 = vector.broadcast %4 : vector<8x1xf32> to vector<8x8xf32>
    %6 = arith.addf %3, %5 : vector<8x8xf32>
    %cst_6 = arith.constant 0.000000e+00 : f32
    %7 = vector.broadcast %cst_6 : f32 to vector<8x8xf32>
    %8 = arith.maximumf %6, %7 : vector<8x8xf32>
    %c0_7 = arith.constant 0 : index
    %c0_8 = arith.constant 0 : index
    %9 = vector.load %arg4[%c0_7, %c0_8] : memref<8x8xf32, #tpu.memory_space<vmem>>, vector<8x8xf32>
    %cst_9 = arith.constant dense<0.000000e+00> : vector<8x8xf32>
    %10 = tpu.matmul %9, %8, %cst_9 {dimension_numbers = #tpu.dot_dimension_numbers<[1], [0], [0], [1], [0, 0, 1, 1], [], []>} : vector<8x8xf32>, vector<8x8xf32>, vector<8x8xf32> -> vector<8x8xf32>
    %c0_10 = arith.constant 0 : index
    %c0_11 = arith.constant 0 : index
    %11 = vector.load %arg5[%c0_10, %c0_11] : memref<8x1xf32, #tpu.memory_space<vmem>>, vector<8x1xf32>
    %12 = vector.broadcast %11 : vector<8x1xf32> to vector<8x8xf32>
    %13 = arith.addf %10, %12 : vector<8x8xf32>
    %cst_12 = arith.constant 0.000000e+00 : f32
    %14 = vector.broadcast %cst_12 : f32 to vector<8x8xf32>
    %15 = arith.maximumf %13, %14 : vector<8x8xf32>
    %c0_13 = arith.constant 0 : index
    %c0_14 = arith.constant 0 : index
    %16 = vector.load %arg6[%c0_13, %c0_14] : memref<8x4xf32, #tpu.memory_space<vmem>>, vector<8x4xf32>
    %cst_15 = arith.constant dense<0.000000e+00> : vector<8x8xf32>
    %17 = tpu.matmul %16, %1, %cst_15 {dimension_numbers = #tpu.dot_dimension_numbers<[1], [0], [0], [1], [0, 0, 1, 1], [], []>} : vector<8x4xf32>, vector<4x8xf32>, vector<8x8xf32> -> vector<8x8xf32>
    %c0_16 = arith.constant 0 : index
    %c0_17 = arith.constant 0 : index
    %18 = vector.load %arg7[%c0_16, %c0_17] : memref<8x1xf32, #tpu.memory_space<vmem>>, vector<8x1xf32>
    %19 = vector.broadcast %18 : vector<8x1xf32> to vector<8x8xf32>
    %20 = arith.addf %17, %19 : vector<8x8xf32>
    %cst_18 = arith.constant 0.000000e+00 : f32
    %21 = vector.broadcast %cst_18 : f32 to vector<8x8xf32>
    %22 = arith.maximumf %20, %21 : vector<8x8xf32>
    %c0_19 = arith.constant 0 : index
    %c0_20 = arith.constant 0 : index
    %c0_21 = arith.constant 0 : index
    %23 = vector.load %arg8[%c0_19, %c0_20, %c0_21] : memref<1x8x8xf32, #tpu.memory_space<vmem>>, vector<1x8x8xf32>
    %24 = vector.shape_cast %23 : vector<1x8x8xf32> to vector<8x8xf32>
    %25 = vector.shape_cast %15 : vector<8x8xf32> to vector<1x8x8xf32>
    tpu.vector_store %arg8[%c0_19, %c0_20, %c0_21], %25 {strides = array<i32>} : memref<1x8x8xf32, #tpu.memory_space<vmem>>, vector<1x8x8xf32>,
    %c0_22 = arith.constant 0 : index
    %c0_23 = arith.constant 0 : index
    %c0_24 = arith.constant 0 : index
    %26 = vector.load %arg9[%c0_22, %c0_23, %c0_24] : memref<1x8x8xf32, #tpu.memory_space<vmem>>, vector<1x8x8xf32>
    %27 = vector.shape_cast %26 : vector<1x8x8xf32> to vector<8x8xf32>
    %28 = vector.shape_cast %22 : vector<8x8xf32> to vector<1x8x8xf32>
    tpu.vector_store %arg9[%c0_22, %c0_23, %c0_24], %28 {strides = array<i32>} : memref<1x8x8xf32, #tpu.memory_space<vmem>>, vector<1x8x8xf32>,
    return
  }
  func.func @transform_0(%arg0: i32) -> (i32, i32, i32) {
    %c0_i32 = arith.constant 0 : i32
    %c0_i32_0 = arith.constant 0 : i32
    %c0_i32_1 = arith.constant 0 : i32
    return %arg0, %c0_i32, %c0_i32_0 : i32, i32, i32
  }
  func.func @transform_1(%arg0: i32) -> (i32, i32) {
    %c0_i32 = arith.constant 0 : i32
    %c0_i32_0 = arith.constant 0 : i32
    %c0_i32_1 = arith.constant 0 : i32
    return %c0_i32, %c0_i32_0 : i32, i32
  }
  func.func @transform_2(%arg0: i32) -> (i32, i32) {
    %c0_i32 = arith.constant 0 : i32
    %c0_i32_0 = arith.constant 0 : i32
    %c0_i32_1 = arith.constant 0 : i32
    return %c0_i32, %c0_i32_0 : i32, i32
  }
  func.func @transform_3(%arg0: i32) -> (i32, i32) {
    %c0_i32 = arith.constant 0 : i32
    %c0_i32_0 = arith.constant 0 : i32
    %c0_i32_1 = arith.constant 0 : i32
    return %c0_i32, %c0_i32_0 : i32, i32
  }
  func.func @transform_4(%arg0: i32) -> (i32, i32) {
    %c0_i32 = arith.constant 0 : i32
    %c0_i32_0 = arith.constant 0 : i32
    %c0_i32_1 = arith.constant 0 : i32
    return %c0_i32, %c0_i32_0 : i32, i32
  }
  func.func @transform_5(%arg0: i32) -> (i32, i32) {
    %c0_i32 = arith.constant 0 : i32
    %c0_i32_0 = arith.constant 0 : i32
    %c0_i32_1 = arith.constant 0 : i32
    return %c0_i32, %c0_i32_0 : i32, i32
  }
  func.func @transform_6(%arg0: i32) -> (i32, i32) {
    %c0_i32 = arith.constant 0 : i32
    %c0_i32_0 = arith.constant 0 : i32
    %c0_i32_1 = arith.constant 0 : i32
    return %c0_i32, %c0_i32_0 : i32, i32
  }
  func.func @transform_7(%arg0: i32) -> (i32, i32, i32) {
    %c0_i32 = arith.constant 0 : i32
    %c0_i32_0 = arith.constant 0 : i32
    %c0_i32_1 = arith.constant 0 : i32
    return %arg0, %c0_i32, %c0_i32_0 : i32, i32, i32
  }
  func.func @transform_8(%arg0: i32) -> (i32, i32, i32) {
    %c0_i32 = arith.constant 0 : i32
    %c0_i32_0 = arith.constant 0 : i32
    %c0_i32_1 = arith.constant 0 : i32
    return %arg0, %c0_i32, %c0_i32_0 : i32, i32, i32
  }
}

</mosaic_0001>

<bundles_post_ra>
// kernel: tpu_custom_call.1
= control target key start
LH: loop header
LB: loop body
LE: loop exit
PB: predicated region body
PF: predicated region fallthrough
CT: control target
= control target key end

     0   :  { %s872_s0 = inlined_call_operand.vmem [shape: f32[2,4,8], index: 0, kind: input, shape index: {}]   ;;  %s873_s1 = inlined_call_operand.vmem [shape: f32[8,4], index: 1, kind: input, shape index: {}]   ;;  %s874_s2 = inlined_call_operand.vmem [shape: f32[8,1], index: 2, kind: input, shape index: {}]   ;;  %s875_s3 = inlined_call_operand.vmem [shape: f32[8,8], index: 3, kind: input, shape index: {}]   ;;  %s876_s4 = inlined_call_operand.vmem [shape: f32[8,1], index: 4, kind: input, shape index: {}]   ;;  %s877_s5 = inlined_call_operand.vmem [shape: f32[8,4], index: 5, kind: input, shape index: {}]   ;;  %s878_s6 = inlined_call_operand.vmem [shape: f32[8,1], index: 6, kind: input, shape index: {}]   ;;  %s879_s7 = inlined_call_operand.hbm [shape: f32[2,8,8], index: 7, kind: output, shape index: {0}]   ;;  %s880_s8 = inlined_call_operand.hbm [shape: f32[2,8,8], index: 8, kind: output, shape index: {1}]  }
   0x1   :  { %881 = sst [smem:[#allocation8_spill]] %s872_s0 }
   0x2   :  { %882 = sst [smem:[#allocation9_spill]] %s873_s1 }
   0x3   :  { %883 = sst [smem:[#allocation10_spill]] %s874_s2 }
   0x4   :  { %14 = vsyncpa [#allocation3], 0 }
   0x5   :  { %16 = vsyncpa [#allocation3 + $0x1], 0 }
   0x6   :  { %17 = vsyncpa [#allocation5], 0 }
   0x7   :  { %19 = vsyncpa [#allocation5 + $0x1], 0  ;;  %s748_s27 = smov 0   ;;  %s750_s28 = smov 0  }
   0x8   :  { %s752_s29 = smov 0   ;;  %s754_s30 = smov 0  }
   0x9 LB: > { %s769_s9 = sadd.s32 4294967295, %s700_s30   ;;  %s541_s10 = sadd.s32 4294967294, %s700_s30   ;;  %s700_s30 = sphi %s754_s30, %s892_s30   ;;  %s696_s29 = sphi %s752_s29, %s891_s29   ;;  %s692_s28 = sphi %s750_s28, %s890_s28   ;;  %s688_s27 = sphi %s748_s27, %s889_s27  }
   0xa   : > { %s773_s11 = sadd.s32 1, %s700_s30   ;;  %s184_s12 = sadd.s32 1, %s696_s29 }
   0xb   : > { %s181_s13 = ssub.s32 %s700_s30, %s773_s11  ;;  %p194_p0 = scmp.ne.s32.totalorder %s696_s29, %s692_s28 }
   0xc   : > { %p182_p1 = scmp.eq.s32.totalorder %s181_s13, 0  ;;  %p195_p2 = scmp.eq.s32.totalorder %s769_s9, 1 }
   0xd   : > { %p200_p3 = scmp.ne.s32.totalorder %s692_s28, %s688_s27  ;;  %p201_p4 = scmp.eq.s32.totalorder %s541_s10, 1 }
   0xe   : > { %s784_s14 = scalar_select %p182_p1, %s696_s29, %s184_s12  }
   0xf   : > { %p786_p5 = por %p195_p2, %p194_p0  ;;  %p790_p6 = por %p201_p4, %p200_p3 }
  0x10   : > { %p544_p7 = scmp.ge.s32.totalorder %s700_s30, 1  ;;  %p270_p8 = scmp.lt.s32.totalorder %s700_s30, 3 }
  0x12   : > { %p271_p9 = pnand %p544_p7, %p270_p8 }
  0x13   : > { %p308_p10 = scmp.lt.s32.totalorder (!%p271_p9), %s769_s9, 1  ;;  %s886_s2 = sld [smem:[#allocation10_spill]] (!%p271_p9) }
  0x14   : > { %274 = sbr.rel (%p271_p9) target bundleno = 295 (0x127), region = 48  ;;  %s887_s0 = sld [smem:[#allocation8_spill]] (!%p271_p9) }
  0x15   : > { %s888_s1 = sld [smem:[#allocation9_spill]] (!%p271_p9)  ;;  %s821_s21 = sand.u32 (!%p271_p9), 1, %s692_s28  }
  0x16   : > { %s545_s22 = sshll.u32 (!%p271_p9), %s821_s21, 3  ;;  %s420_s17 = scalar_lea.sflag (!%p271_p9), [#allocation5], %s821_s21 }
  0x17   : > { %s307_s10 = scalar_lea.vmem (!%p271_p9), [#allocation4], %s545_s22  ;;  %s626_s24 = scalar_lea.hbm (!%p271_p9), %s880_s8, 16 }
  0x18   : > { %s446_s12 = sshll.u32 (!%p271_p9), %s307_s10, 4  ;;  %s447_s12 = int_to_ptr.vmem [resolvable:$true] %s446_s12 }
  0x19   : > { %v314_v0 = vld [vmem:[%s886_s2] sm:$0xff]  ;;  %v702_v1 = vmov 0   ;;  %s309_s19 = scalar_select %p308_p10, %s769_s9, 1  ;;  %vm324_vm0 = vcmask 1043456   ;;  %vm320_vm1 = vcmask 31744   ;;  %vm356_vm2 = vcmask 64512  }
  0x1a   : > { %604 = vset.pattern.permute.xlu0 %v702_v1  ;;  %605 = vset.pattern.permute.xlu1 %v702_v1  ;;  %v350_v4 = vld [vmem:[%s876_s4] sm:$0xff] }
  0x1b   : > { %317 = vperm.xlu0 %604, %v314_v0   ;;  %s547_s20 = sshll.u32 %s309_s19, 2  ;;  %v313_v2 = vld [vmem:[%s888_s1] sm:$0xff] }
  0x1c   : > { %s311_s23 = scalar_lea.vmem %s887_s0, %s547_s20  ;;  %v381_v5 = vld [vmem:[%s877_s5] sm:$0xff] }
  0x1d   : > { %v312_v3 = vld [vmem:[%s311_s23] sm:$0xf]  ;;  %s555_s23 = sshll.u32 %s769_s9, 3 }
  0x1e   : > { %548 = vmatpush.msk.msra.mxu0 %vm324_vm0, %v312_v3  ;;  %551 = vmatpush.msk.msra.mxu2 %vm324_vm0, %v312_v3  ;;  %v382_v6 = vld [vmem:[%s878_s6] sm:$0xff]  ;;  %s444_s26 = scalar_lea.hbm %s880_s8, %s555_s23 }
  0x1f   : > { %549 = vmatmul.msk.f32.vlgmr.msra.gmra.mxu0 %vm320_vm1, %v313_v2  ;;  %552 = vmatmul.msk.f32.vlgmr.msra.gmra.mxu2 %vm320_vm1, %v381_v5  ;;  %v349_v11 = vld [vmem:[%s875_s3] sm:$0xff]  ;;  %s448_s13 = sshll.u32 %s444_s26, 4  ;;  %s449_s13 = int_to_ptr.hbm [resolvable:$true] %s448_s13 }
  0x20   : > { %385 = vperm.xlu1 %605, %v382_v6   ;;  %s620_s18 = sshra.s32 %s449_s13, 4  ;;  %s621_s18 = int_to_ptr.hbm [resolvable:$true] %s620_s18 }
  0x21   : > { %s622_s9 = scalar_lea.hbm %s621_s18, 8  ;;  %p627_p0 = scmp.lt.s32.totalorder %s621_s18, %s880_s8 }
  0x22   : > { %p623_p11 = scmp.ne.s32.totalorder %s621_s18, %s622_s9  ;;  %p628_p1 = scmp.lt.s32.totalorder %s626_s24, %s622_s9 }
  0x23   : > { %353 = vperm.xlu0 %604, %v350_v4  }
  0x24   : > { %p624_p12 = pnand %p623_p11, %p786_p5  ;;  %p629_p2 = por %p628_p1, %p627_p0 }
  0x26   : > { %p625_p13 = pneg %p624_p12 }
  0x28   : > { %p630_p3 = pnand %p629_p2, %p625_p13 }
  0x8d   : > { %v318_v7 = vpop.permute.xlu0 %317 }
  0x92   : > { %v386_v12 = vpop.permute.xlu1 %385 }
  0x9c   : > { %v345_v8 = vpop.f32.mrf.mxu0 }
  0x9d   : > { %v346_v9 = vadd.f32 %v345_v8, %v318_v7 }
  0x9f   : > { %v348_v10 = vmax.f32 %v346_v9, 0.0 }
  0xa1   : > { %375 = vmatpush.msra.mxu1 %v348_v10 }
  0xa2   : > { %550 = vmatmul.msk.f32.vlgmr.msra.gmra.mxu1 %vm356_vm2, %v349_v11  ;;  %v408_v13 = vpop.f32.mrf.mxu2 }
  0xa3   : > { %v409_v14 = vadd.f32 %v408_v13, %v386_v12 }
  0xa5   : > { %v411_v15 = vmax.f32 %v409_v14, 0.0 }
  0xa7   : > { %413 = vst.msk [vmem:[%s307_s10] sm:$0xff] %vm356_vm2, %v411_v15 }
  0xa8   : > { %633 = shalt.err (!%p630_p3)
}
  0xa9   : > { %560 = dma.vmem_to_hbm [thread:$0]  (%p786_p5), %s447_s12, 128, %s449_s13, %s420_s17   ;;  %v354_v16 = vpop.permute.xlu0 %353 }
  0xaa   : > { %s430_s1 = scalar_lea.hbm %s879_s7, %s555_s23  ;;  %s300_s19 = scalar_lea.vmem [#allocation2], %s545_s22 }
  0xab   : > { %s432_s20 = sshll.u32 %s300_s19, 4  ;;  %s434_s2 = sshll.u32 %s430_s1, 4  ;;  %s433_s20 = int_to_ptr.vmem [resolvable:$true] %s432_s20  ;;  %s435_s2 = int_to_ptr.hbm [resolvable:$true] %s434_s2 }
  0xac   : > { %s415_s18 = scalar_lea.sflag [#allocation3], %s821_s21  ;;  %s648_s9 = sshra.s32 %s435_s2, 4  ;;  %s649_s9 = int_to_ptr.hbm [resolvable:$true] %s648_s9 }
  0xad   : > { %s650_s12 = scalar_lea.hbm %s649_s9, 8  ;;  %s654_s22 = scalar_lea.hbm %s879_s7, 16 }
  0xae   : > { %p651_p4 = scmp.ne.s32.totalorder %s649_s9, %s650_s12  ;;  %p655_p9 = scmp.lt.s32.totalorder %s649_s9, %s879_s7 }
  0xaf   : > { %p656_p10 = scmp.lt.s32.totalorder %s654_s22, %s650_s12 }
  0xb0   : > { %p652_p7 = pnand %p651_p4, %p786_p5 }
  0xb1   : > { %p657_p11 = por %p656_p10, %p655_p9 }
  0xb2   : > { %p653_p8 = pneg %p652_p7 }
  0xb4   : > { %p658_p12 = pnand %p657_p11, %p653_p8 }
 0x11f   : > { %v377_v17 = vpop.f32.mrf.mxu1 }
 0x120   : > { %v378_v18 = vadd.f32 %v377_v17, %v354_v16 }
 0x122   : > { %v380_v19 = vmax.f32 %v378_v18, 0.0 }
 0x124   : > { %412 = vst.msk [vmem:[%s300_s19] sm:$0xff] %vm356_vm2, %v380_v19 }
 0x125   : > { %661 = shalt.err (!%p658_p12)
}
 0x126   : > { %559 = dma.vmem_to_hbm [thread:$0]  (%p786_p5), %s433_s20, 128, %s435_s2, %s415_s18  }
 0x127 PF: > { %p570_p13 = scmp.ge.s32.totalorder %s700_s30, 2  ;;  %s460_s21 = sand.u32 1, %s688_s27  }
 0x128   : > { %s461_s17 = scalar_lea.sflag [#allocation3], %s460_s21 }
 0x129   : > { %p564_p0 = pnand %p570_p13, %p790_p6 }
 0x12b   : > { %p565_p1 = pneg %p564_p0 }
 0x12d   : > { %679 = dma.done.wait (%p565_p1), %s461_s17, 128  }
 0x12e   : > { %681 = vsyncadd (%p565_p1), %s461_s17, 4294967168  ;;  %s471_s24 = scalar_lea.sflag [#allocation5], %s460_s21 }
 0x12f   : > { %683 = dma.done.wait (%p565_p1), %s471_s24, 128  }
 0x130   : > { %685 = vsyncadd (%p565_p1), %s471_s24, 4294967168  ;;  %p22_p5 = scmp.ge.s32.totalorder %s773_s11, 4   ;;  %s889_s27 = smov %s692_s28 }
 0x131   : > { %s890_s28 = smov %s696_s29  ;;  %s891_s29 = smov %s784_s14 }
 0x132   : > { %s892_s30 = smov %s773_s11  ;;  %24 = sbr.rel (!%p22_p5) target bundleno = 9 (0x9), region = 100 }
 0x137   :  { %477 = vsyncpa [#allocation3], 1 }
 0x138   :  { %479 = vsyncpa [#allocation3 + $0x1], 1 }
 0x139   :  { %480 = vsyncpa [#allocation5], 1 }
 0x13a   :  { %482 = vsyncpa [#allocation5 + $0x1], 1 }

</bundles_post_ra>
